<compile_context>
chip_gen: v7x
topology: tpu7x:2x2x1
jax: 0.10.0
libtpu: 0.0.40
codegen_flags: <defaults>
</compile_context>

<pallas_src>
import jax
import jax.numpy as jnp
from jax.experimental import pallas as pl
from jax.experimental.pallas import tpu as pltpu

# split sizes along the channel axis (dim=1), as in the PyTorch module
SPLIT_SIZES = (16, 48, 8)
TOTAL_C = sum(SPLIT_SIZES)  # 72

# DMA chunking policy: a few large contiguous copies in flight.
_MAX_CHUNKS = 4
_MIN_CHUNK_BYTES = 1 << 20  # don't split chunks below ~1 MiB


def _chunk_rows(rows, row_bytes):
    """Even partition of the leading axis: <= _MAX_CHUNKS chunks, each >= ~1 MiB."""
    by_size = max(1, (rows * row_bytes) // _MIN_CHUNK_BYTES)
    n = int(min(_MAX_CHUNKS, rows, by_size))
    n = max(n, 1)
    base, rem = divmod(rows, n)
    bounds, start = [], 0
    for j in range(n):
        size = base + (1 if j < rem else 0)
        if size:
            bounds.append((start, size))
        start += size
    return bounds


def _make_dma_copy_kernel(chunks):
    """HBM->HBM copy of disjoint leading-axis ranges, all DMAs in flight, then wait."""

    def kernel(x_hbm, o_hbm, sem):
        copies = []
        for j, (start, size) in enumerate(chunks):
            cp = pltpu.make_async_copy(
                x_hbm.at[pl.ds(start, size)],
                o_hbm.at[pl.ds(start, size)],
                sem.at[j],
            )
            cp.start()
            copies.append(cp)
        for cp in copies:
            cp.wait()

    return kernel


def _dma_copy(x):
    """Identity copy of `x` (any shape) via chunked HBM->HBM DMA, no VMEM staging."""
    rows = x.shape[0]
    row_bytes = (x.size // max(rows, 1)) * jnp.dtype(x.dtype).itemsize
    chunks = _chunk_rows(rows, row_bytes)
    kernel = _make_dma_copy_kernel(chunks)
    return pl.pallas_call(
        kernel,
        out_shape=jax.ShapeDtypeStruct(x.shape, x.dtype),
        in_specs=[pl.BlockSpec(memory_space=pl.ANY)],
        out_specs=pl.BlockSpec(memory_space=pl.ANY),
        scratch_shapes=[pltpu.SemaphoreType.DMA((len(chunks),))],
    )(x)


def split_cat(x):
    assert x.shape[1] == TOTAL_C, (
        f"channel dim must be {TOTAL_C} to match split sizes {SPLIT_SIZES}"
    )
    orig_shape = x.shape
    total = x.size

    # Prefer a wide lane-dense 2-D view (free reshape for a contiguous array)
    # so each DMA chunk is a large contiguous range; otherwise DMA the 4-D
    # tensor directly, chunked along the batch axis (DMA has no (8,128)
    # tiling constraint, so there is no weak fallback anymore).
    lanes = None
    for cand in (1024, 512, 256, 128):
        if total % cand == 0:
            lanes = cand
            break
    if lanes is not None:
        out = _dma_copy(x.reshape(total // lanes, lanes))
        return out.reshape(orig_shape)
    return _dma_copy(x)


if __name__ == "__main__":
    key = jax.random.PRNGKey(0)
    # NOTE: the reference script's example input (1, 20, 1, 1) is inconsistent
    # with split sizes [16, 48, 8]; we use C=72 so forward() is well-defined.
    x = jax.random.normal(key, (2, TOTAL_C, 16, 16), dtype=jnp.float32)

    out = split_cat(x)
    jax.block_until_ready(out)

    # Reference semantics in plain JAX: split at [16, 64] then concat == identity.
    ref = jnp.concatenate(
        jnp.split(x, indices_or_sections=[16, 64], axis=1), axis=1
    )
    assert out.shape == x.shape and out.dtype == x.dtype
    assert jnp.allclose(out, ref)

    print("KERNEL_OK")
</pallas_src>

<mosaic_0001>
module attributes {stable_mosaic.version = 11 : i64} {
  func.func @kernel(%arg0: memref<36x1024xf32, #tpu.memory_space<any>>, %arg1: memref<36x1024xf32, #tpu.memory_space<any>>, %arg2: memref<1x!tpu.dma_semaphore, #tpu.memory_space<semaphore_mem>>) attributes {dimension_semantics = [], scalar_prefetch = 0 : i64, scratch_operands = 1 : i64, tpu.core_type = #tpu.core_type<tc>} {
    %c0_i32 = arith.constant 0 : i32
    %c0_i32_0 = arith.constant 0 : i32
    %c0_i32_1 = arith.constant 0 : i32
    %0 = tpu.memref_slice %arg0[%c0_i32_0, %c0_i32_1] : memref<36x1024xf32, #tpu.memory_space<any>> -> memref<36x1024xf32, #tpu.memory_space<any>>
    %c0_i32_2 = arith.constant 0 : i32
    %c0_i32_3 = arith.constant 0 : i32
    %1 = tpu.memref_slice %arg1[%c0_i32_2, %c0_i32_3] : memref<36x1024xf32, #tpu.memory_space<any>> -> memref<36x1024xf32, #tpu.memory_space<any>>
    %2 = tpu.memref_slice %arg2[%c0_i32] : memref<1x!tpu.dma_semaphore, #tpu.memory_space<semaphore_mem>> -> memref<1x!tpu.dma_semaphore, #tpu.memory_space<semaphore_mem>>
    %3 = tpu.memref_squeeze %2 : memref<1x!tpu.dma_semaphore, #tpu.memory_space<semaphore_mem>> -> memref<!tpu.dma_semaphore, #tpu.memory_space<semaphore_mem>>
    tpu.enqueue_dma source(%0 : memref<36x1024xf32, #tpu.memory_space<any>>) target(%1 : memref<36x1024xf32, #tpu.memory_space<any>>) target_semaphore(%3 : memref<!tpu.dma_semaphore, #tpu.memory_space<semaphore_mem>>)
    %c0_i32_4 = arith.constant 0 : i32
    %c0_i32_5 = arith.constant 0 : i32
    %c0_i32_6 = arith.constant 0 : i32
    %4 = tpu.memref_slice %arg0[%c0_i32_5, %c0_i32_6] : memref<36x1024xf32, #tpu.memory_space<any>> -> memref<36x1024xf32, #tpu.memory_space<any>>
    %c0_i32_7 = arith.constant 0 : i32
    %c0_i32_8 = arith.constant 0 : i32
    %5 = tpu.memref_slice %arg1[%c0_i32_7, %c0_i32_8] : memref<36x1024xf32, #tpu.memory_space<any>> -> memref<36x1024xf32, #tpu.memory_space<any>>
    %6 = tpu.memref_slice %arg2[%c0_i32_4] : memref<1x!tpu.dma_semaphore, #tpu.memory_space<semaphore_mem>> -> memref<1x!tpu.dma_semaphore, #tpu.memory_space<semaphore_mem>>
    %7 = tpu.memref_squeeze %6 : memref<1x!tpu.dma_semaphore, #tpu.memory_space<semaphore_mem>> -> memref<!tpu.dma_semaphore, #tpu.memory_space<semaphore_mem>>
    tpu.wait_dma2 semaphore(%7 : memref<!tpu.dma_semaphore, #tpu.memory_space<semaphore_mem>>) src(%4 : memref<36x1024xf32, #tpu.memory_space<any>>) dst(%5 : memref<36x1024xf32, #tpu.memory_space<any>>)
    return
  }
}

</mosaic_0001>

<bundles_post_ra>
// kernel: tpu_custom_call.1
= control target key start
LH: loop header
LB: loop body
LE: loop exit
PB: predicated region body
PF: predicated region fallthrough
CT: control target
= control target key end

     0   :  { %s35_s6 = smov [#allocation2]   ;;  %s36_s7 = smov [#allocation3]   ;;  %s54_s0 = inlined_call_operand.hbm [shape: f32[36,1024], index: 0, kind: input, shape index: {}]   ;;  %s55_s1 = inlined_call_operand.hbm [shape: f32[36,1024], index: 1, kind: output, shape index: {}]  }
   0x1   :  { %s37_s8 = smov 0  }
   0x2   :  { %18 = dma.general %s54_s0, 5120, %s55_s1, %s35_s6, %s36_s7, [#allocation4], %s37_s8, 0  }
   0x3   :  { %33 = dma.done.wait [#allocation2], 5120 }
   0x4   :  { %34 = vsyncadd [#allocation2], 4294962176 }
   0x5   :  { %23 = vsyncmov [#allocation2] }
   0x8   :  { %s24_s13 = vpop.sfrf %23 }
   0x9   :  { %p29_p0 = scmp.ne.s32.totalorder %s24_s13, 0 }
   0xb   :  { %28 = shalt.err (%p29_p0)  }

</bundles_post_ra>
